<compile_context>
chip_gen: v7x
topology: tpu7x:2x2x1
jax: 0.10.0
libtpu: 0.0.40
codegen_flags: <defaults>
</compile_context>

<pallas_src>
import functools

import jax
import jax.numpy as jnp
from jax.experimental import pallas as pl
from jax.experimental.pallas import tpu as pltpu

HIDDEN = 128


def _cdiv(a, b):
    return -(-a // b)


def _round_up(a, m):
    return _cdiv(a, m) * m


def anet2_kernel(x_ref, p_ref, s2_ref,
                 w1_ref, b1_ref,
                 w2_ref, b2_ref, w3_ref, b3_ref,
                 w4_ref, b4_ref, w5_ref, b5_ref,
                 wo_ref, bo_ref,
                 out_ref, *, sigmoid_dtype):
    x = x_ref[...]                        # [TB, L*E] f32 (lane-dense)
    p = p_ref[...]                        # [TB, P]   f32
    s2 = s2_ref[...]                      # [2*L*E, 2*L] f32 block-diagonal

    L = s2.shape[-1] // 2
    E = x.shape[-1] // L
    inv_em1 = 1.0 / (E - 1)               # ensemble size >= 2 (asserted in wrapper)

    def silu(z):
        # sigmoid on the EUP (bf16 on v6e/v7x, f32 elsewhere); mul stays f32.
        return z * jax.nn.sigmoid(z.astype(sigmoid_dtype)).astype(jnp.float32)

    # ONE fused MXU matmul yields [per-lead-time mean | per-lead-time sum(x^2)]
    # (K = 2*L*E = 256 exactly fills the v6e/v7x MXU depth).
    # TODO(synk): one-pass variance is cancellation-prone when |mean| >> std;
    # switch to a centered second pass / XLU roll-tree if realistic data needs it.
    xx = jnp.concatenate([x, x * x], axis=-1)                       # [TB, 2LE]
    stats = jnp.dot(xx, s2, preferred_element_type=jnp.float32)     # [TB, 2L]
    m = stats[:, :L]                                                # mean (1/E folded into s2)
    ssq = stats[:, L:]                                              # sum of squares
    var = jnp.maximum(ssq - (m * m) * E, 0.0) * inv_em1             # unbiased, ddof=1
    s = jnp.sqrt(var)                                               # std

    # Fused first Linear on [m ; s ; p] against the row-permuted w1.
    feat = jnp.concatenate([m, s, p], axis=-1).astype(jnp.bfloat16)  # [TB, 2L+P]
    z = jnp.dot(feat, w1_ref[...], preferred_element_type=jnp.float32) + b1_ref[...]
    h = silu(z)

    # 4x SkipBlock(128): SiLU(Linear(h)) + h.  bf16 MXU operands, f32 accumulate.
    # TODO(synk): nn.Dropout(0.2) inside SkipBlock is identity (eval mode).
    for w_ref, b_ref in ((w2_ref, b2_ref), (w3_ref, b3_ref),
                         (w4_ref, b4_ref), (w5_ref, b5_ref)):
        z = jnp.dot(h.astype(jnp.bfloat16), w_ref[...],
                    preferred_element_type=jnp.float32) + b_ref[...]
        h = silu(z) + h

    # Final Linear(128, out_features) padded only to 8 lanes (was 128).
    out_ref[...] = (jnp.dot(h.astype(jnp.bfloat16), wo_ref[...],
                            preferred_element_type=jnp.float32)
                    + bo_ref[...]).astype(out_ref.dtype)


def prepare_params(params, lead_time, ensemble_size):
    """One-time host-side preprocessing (hoisted out of the per-call path)."""
    L, E = lead_time, ensemble_size
    LE = L * E
    out_features = params["wo"].shape[1]
    out_pad = _round_up(out_features, 8)          # narrow lane-padded output head

    # Block-diagonal statistics matrix: left block averages each lead time's E
    # members (entries 1/E -> mean), right block sums their squares.
    eye = (jnp.arange(LE)[:, None] // E == jnp.arange(L)[None, :]).astype(jnp.float32)
    s2 = jnp.zeros((2 * LE, 2 * L), jnp.float32)
    s2 = s2.at[:LE, :L].set(eye / E).at[LE:, L:].set(eye)

    # Permute w1 rows from the interleaved [m0,s0,m1,s1,...,p] order to
    # [mean rows ; std rows ; predictor rows] so one matmul covers the layer.
    w1 = params["w1"]
    w1r = jnp.concatenate([w1[0:2 * L:2], w1[1:2 * L:2], w1[2 * L:]],
                          axis=0).astype(jnp.bfloat16)

    wo = jnp.zeros((HIDDEN, out_pad), jnp.float32
                   ).at[:, :out_features].set(params["wo"]).astype(jnp.bfloat16)
    bo = jnp.zeros((1, out_pad), jnp.float32).at[:, :out_features].set(params["bo"])

    bf = lambda k: params[k].astype(jnp.bfloat16)
    brow = lambda k: params[k][None, :].astype(jnp.float32)
    return dict(s2=s2, w1=w1r, b1=brow("b1"),
                w2=bf("w2"), b2=brow("b2"), w3=bf("w3"), b3=brow("b3"),
                w4=bf("w4"), b4=brow("b4"), w5=bf("w5"), b5=brow("b5"),
                wo=wo, bo=bo)


def default_sigmoid_dtype():
    """bf16 sigmoid on chips with a bf16 EUP (v6e / v7x), f32 otherwise."""
    try:
        kind = jax.devices()[0].device_kind.lower()
    except Exception:
        return jnp.float32
    if any(t in kind for t in ("v2", "v3", "v4", "v5")):
        return jnp.float32
    return jnp.bfloat16


@functools.partial(jax.jit, static_argnames=("out_features", "tb", "sigmoid_dtype"))
def anet2_forward(x, p, prep, *, out_features, tb=2048, sigmoid_dtype=jnp.bfloat16):
    """x: [B, L, E] f32, p: [B, P] f32 -> [B, out_features] f32."""
    B, L, E = x.shape
    assert E >= 2, "unbiased std over the ensemble axis needs E >= 2"
    P = p.shape[-1]
    LE = L * E
    out_pad = prep["wo"].shape[1]

    # Batch tile: multiple of 8 sublanes, no larger than the batch needs, and
    # split so the "parallel" grid keeps >= 2 steps for v7x's two TensorCores.
    tb = max(8, (int(tb) // 8) * 8)
    tb = min(tb, _round_up(B, 8))
    if B > 8 and _cdiv(B, tb) < 2:
        tb = _round_up(_cdiv(B, 2), 8)
    n_tiles = _cdiv(B, tb)   # ragged last tile: rows >= B are per-row-independent
                             # garbage on input and clipped on writeback.

    x_flat = x.reshape(B, LE).astype(jnp.float32)   # lane-dense [B, L*E]
    p_f = p.astype(jnp.float32)

    args = (x_flat, p_f, prep["s2"],
            prep["w1"], prep["b1"],
            prep["w2"], prep["b2"], prep["w3"], prep["b3"],
            prep["w4"], prep["b4"], prep["w5"], prep["b5"],
            prep["wo"], prep["bo"])

    def resident(a):
        # Whole-array block + constant index_map -> stays in VMEM across tiles.
        nd = a.ndim
        return pl.BlockSpec(a.shape, lambda i, _nd=nd: (0,) * _nd)

    # (If a v5e profile still shows exposed input DMA, the x spec below can get
    #  pipeline_mode=pl.Buffered(3); not enabled by default.)
    in_specs = [pl.BlockSpec((tb, LE), lambda i: (i, 0)),       # x batch tile
                pl.BlockSpec((tb, P), lambda i: (i, 0))]        # p batch tile
    in_specs += [resident(a) for a in args[2:]]

    out = pl.pallas_call(
        functools.partial(anet2_kernel, sigmoid_dtype=sigmoid_dtype),
        out_shape=jax.ShapeDtypeStruct((B, out_pad), jnp.float32),
        grid=(n_tiles,),
        in_specs=in_specs,
        out_specs=pl.BlockSpec((tb, out_pad), lambda i: (i, 0)),
        compiler_params=pltpu.CompilerParams(
            dimension_semantics=("parallel",),
            vmem_limit_bytes=48 * 1024 * 1024),
    )(*args)
    return out[:, :out_features]


def init_params(key, in_features, out_features, hidden=HIDDEN):
    """Deterministic synthetic parameters (shapes match the PyTorch module)."""
    keys = jax.random.split(key, 12)

    def lin(kw, kb, fan_in, fan_out):
        w = jax.random.normal(kw, (fan_in, fan_out), jnp.float32) / jnp.sqrt(fan_in)
        b = jax.random.normal(kb, (fan_out,), jnp.float32) * 0.01
        return w, b

    params = {}
    params["w1"], params["b1"] = lin(keys[0], keys[1], in_features, hidden)
    params["w2"], params["b2"] = lin(keys[2], keys[3], hidden, hidden)
    params["w3"], params["b3"] = lin(keys[4], keys[5], hidden, hidden)
    params["w4"], params["b4"] = lin(keys[6], keys[7], hidden, hidden)
    params["w5"], params["b5"] = lin(keys[8], keys[9], hidden, hidden)
    params["wo"], params["bo"] = lin(keys[10], keys[11], hidden, out_features)
    return params


def reference_forward(x, p, params):
    """Pure-JAX f32 mirror of the PyTorch forward (eval mode), for validation."""
    m = jnp.mean(x, axis=-1, keepdims=True)
    s = jnp.std(x, axis=-1, keepdims=True, ddof=1)
    feat = jnp.concatenate([m, s], axis=-1).reshape(x.shape[0], -1)
    feat = jnp.concatenate([feat, p], axis=-1)
    h = jax.nn.silu(feat @ params["w1"] + params["b1"])
    for k in (2, 3, 4, 5):
        h = jax.nn.silu(h @ params[f"w{k}"] + params[f"b{k}"]) + h
    return h @ params["wo"] + params["bo"]


if __name__ == "__main__":
    key = jax.random.PRNGKey(0)
    L, E, P = 8, 16, 4                 # lead_time, ensemble size, predictors
    out_features = 3
    in_features = L * 2 + P            # lead_time*2 + number_of_predictors

    kx, kp, kw = jax.random.split(key, 3)
    params = init_params(kw, in_features, out_features)
    prep = prepare_params(params, lead_time=L, ensemble_size=E)   # hoisted, once
    sig_dt = default_sigmoid_dtype()

    # Small demo batch + a ragged multi-tile batch to exercise the grid path.
    for B in (2, 300):
        x = jax.random.normal(jax.random.fold_in(kx, B), (B, L, E), jnp.float32)
        p = jax.random.normal(jax.random.fold_in(kp, B), (B, P), jnp.float32)

        out = anet2_forward(x, p, prep, out_features=out_features,
                            sigmoid_dtype=sig_dt)
        jax.block_until_ready(out)
        assert out.shape == (B, out_features)

        ref = reference_forward(x, p, params)
        err = float(jnp.max(jnp.abs(out - ref)))
        # bf16 MXU operands (+ bf16 EUP sigmoid on v6e/v7x) across 6 dense
        # layers vs an all-f32 reference.
        assert jnp.allclose(out, ref, atol=1e-1, rtol=5e-2), \
            f"B={B}: mismatch vs f32 reference, max|err|={err}"

    print("KERNEL_OK")
</pallas_src>

<mosaic_0001>
module attributes {stable_mosaic.version = 11 : i64} {
  func.func @anet2_kernel(%arg0: i32, %arg1: memref<8x128xf32, #tpu.memory_space<vmem>>, %arg2: memref<8x4xf32, #tpu.memory_space<vmem>>, %arg3: memref<256x16xf32, #tpu.memory_space<vmem>>, %arg4: memref<20x128xbf16, #tpu.memory_space<vmem>>, %arg5: memref<1x128xf32, #tpu.memory_space<vmem>>, %arg6: memref<128x128xbf16, #tpu.memory_space<vmem>>, %arg7: memref<1x128xf32, #tpu.memory_space<vmem>>, %arg8: memref<128x128xbf16, #tpu.memory_space<vmem>>, %arg9: memref<1x128xf32, #tpu.memory_space<vmem>>, %arg10: memref<128x128xbf16, #tpu.memory_space<vmem>>, %arg11: memref<1x128xf32, #tpu.memory_space<vmem>>, %arg12: memref<128x128xbf16, #tpu.memory_space<vmem>>, %arg13: memref<1x128xf32, #tpu.memory_space<vmem>>, %arg14: memref<128x8xbf16, #tpu.memory_space<vmem>>, %arg15: memref<1x8xf32, #tpu.memory_space<vmem>>, %arg16: memref<8x8xf32, #tpu.memory_space<vmem>>) attributes {dimension_semantics = [#tpu.dimension_semantics<parallel>], iteration_bounds = array<i64: 1>, scalar_prefetch = 0 : i64, scratch_operands = 0 : i64, tpu.core_type = #tpu.core_type<tc>, window_params = [{transform_indices = @transform_0, window_bounds = array<i64: 8, 128>}, {transform_indices = @transform_1, window_bounds = array<i64: 8, 4>}, {pipeline_mode = #tpu.pipeline_mode<synchronous>, transform_indices = @transform_2, window_bounds = array<i64: 256, 16>}, {pipeline_mode = #tpu.pipeline_mode<synchronous>, transform_indices = @transform_3, window_bounds = array<i64: 20, 128>}, {pipeline_mode = #tpu.pipeline_mode<synchronous>, transform_indices = @transform_4, window_bounds = array<i64: 1, 128>}, {pipeline_mode = #tpu.pipeline_mode<synchronous>, transform_indices = @transform_5, window_bounds = array<i64: 128, 128>}, {pipeline_mode = #tpu.pipeline_mode<synchronous>, transform_indices = @transform_6, window_bounds = array<i64: 1, 128>}, {pipeline_mode = #tpu.pipeline_mode<synchronous>, transform_indices = @transform_7, window_bounds = array<i64: 128, 128>}, {pipeline_mode = #tpu.pipeline_mode<synchronous>, transform_indices = @transform_8, window_bounds = array<i64: 1, 128>}, {pipeline_mode = #tpu.pipeline_mode<synchronous>, transform_indices = @transform_9, window_bounds = array<i64: 128, 128>}, {pipeline_mode = #tpu.pipeline_mode<synchronous>, transform_indices = @transform_10, window_bounds = array<i64: 1, 128>}, {pipeline_mode = #tpu.pipeline_mode<synchronous>, transform_indices = @transform_11, window_bounds = array<i64: 128, 128>}, {pipeline_mode = #tpu.pipeline_mode<synchronous>, transform_indices = @transform_12, window_bounds = array<i64: 1, 128>}, {pipeline_mode = #tpu.pipeline_mode<synchronous>, transform_indices = @transform_13, window_bounds = array<i64: 128, 8>}, {pipeline_mode = #tpu.pipeline_mode<synchronous>, transform_indices = @transform_14, window_bounds = array<i64: 1, 8>}, {transform_indices = @transform_15, window_bounds = array<i64: 8, 8>}]} {
    %c0 = arith.constant 0 : index
    %c0_0 = arith.constant 0 : index
    %0 = vector.load %arg1[%c0, %c0_0] : memref<8x128xf32, #tpu.memory_space<vmem>>, vector<8x128xf32>
    %c0_1 = arith.constant 0 : index
    %c0_2 = arith.constant 0 : index
    %1 = vector.load %arg2[%c0_1, %c0_2] : memref<8x4xf32, #tpu.memory_space<vmem>>, vector<8x4xf32>
    %c0_3 = arith.constant 0 : index
    %c0_4 = arith.constant 0 : index
    %2 = vector.load %arg3[%c0_3, %c0_4] : memref<256x16xf32, #tpu.memory_space<vmem>>, vector<256x16xf32>
    %3 = arith.mulf %0, %0 : vector<8x128xf32>
    %4 = tpu.concatenate %0, %3 in 1 : vector<8x128xf32>, vector<8x128xf32> -> vector<8x256xf32>
    %cst = arith.constant dense<0.000000e+00> : vector<8x16xf32>
    %5 = tpu.matmul %4, %2, %cst {dimension_numbers = #tpu.dot_dimension_numbers<[1], [0], [0], [1], [0, 0, 1, 1], [], []>} : vector<8x256xf32>, vector<256x16xf32>, vector<8x16xf32> -> vector<8x16xf32>
    %6 = vector.extract_strided_slice %5 {offsets = [0, 0], sizes = [8, 8], strides = [1, 1]} : vector<8x16xf32> to vector<8x8xf32>
    %7 = vector.extract_strided_slice %5 {offsets = [0, 8], sizes = [8, 8], strides = [1, 1]} : vector<8x16xf32> to vector<8x8xf32>
    %8 = arith.mulf %6, %6 : vector<8x8xf32>
    %cst_5 = arith.constant 1.600000e+01 : f32
    %9 = vector.broadcast %cst_5 : f32 to vector<8x8xf32>
    %10 = arith.mulf %8, %9 : vector<8x8xf32>
    %11 = arith.subf %7, %10 : vector<8x8xf32>
    %cst_6 = arith.constant 0.000000e+00 : f32
    %12 = vector.broadcast %cst_6 : f32 to vector<8x8xf32>
    %13 = arith.maximumf %11, %12 : vector<8x8xf32>
    %cst_7 = arith.constant 0.0666666701 : f32
    %14 = vector.broadcast %cst_7 : f32 to vector<8x8xf32>
    %15 = arith.mulf %13, %14 : vector<8x8xf32>
    %16 = math.sqrt %15 : vector<8x8xf32>
    %17 = tpu.concatenate %6, %16, %1 in 1 : vector<8x8xf32>, vector<8x8xf32>, vector<8x4xf32> -> vector<8x20xf32>
    %18 = arith.truncf %17 : vector<8x20xf32> to vector<8x20xbf16>
    %c0_8 = arith.constant 0 : index
    %c0_9 = arith.constant 0 : index
    %19 = vector.load %arg4[%c0_8, %c0_9] : memref<20x128xbf16, #tpu.memory_space<vmem>>, vector<20x128xbf16>
    %cst_10 = arith.constant dense<0.000000e+00> : vector<8x128xf32>
    %20 = tpu.matmul %18, %19, %cst_10 {dimension_numbers = #tpu.dot_dimension_numbers<[1], [0], [0], [1], [0, 0, 1, 1], [], []>} : vector<8x20xbf16>, vector<20x128xbf16>, vector<8x128xf32> -> vector<8x128xf32>
    %c0_11 = arith.constant 0 : index
    %c0_12 = arith.constant 0 : index
    %21 = vector.load %arg5[%c0_11, %c0_12] : memref<1x128xf32, #tpu.memory_space<vmem>>, vector<1x128xf32>
    %22 = vector.broadcast %21 : vector<1x128xf32> to vector<8x128xf32>
    %23 = arith.addf %20, %22 : vector<8x128xf32>
    %24 = arith.truncf %23 : vector<8x128xf32> to vector<8x128xbf16>
    %25 = arith.negf %24 : vector<8x128xbf16>
    %26 = math.exp %25 : vector<8x128xbf16>
    %cst_13 = arith.constant 1.000000e+00 : bf16
    %27 = vector.broadcast %cst_13 : bf16 to vector<8x128xbf16>
    %28 = arith.addf %27, %26 : vector<8x128xbf16>
    %29 = arith.divf %27, %28 : vector<8x128xbf16>
    %30 = arith.extf %29 : vector<8x128xbf16> to vector<8x128xf32>
    %31 = arith.mulf %23, %30 : vector<8x128xf32>
    %32 = arith.truncf %31 : vector<8x128xf32> to vector<8x128xbf16>
    %c0_14 = arith.constant 0 : index
    %c0_15 = arith.constant 0 : index
    %33 = vector.load %arg6[%c0_14, %c0_15] : memref<128x128xbf16, #tpu.memory_space<vmem>>, vector<128x128xbf16>
    %cst_16 = arith.constant dense<0.000000e+00> : vector<8x128xf32>
    %34 = tpu.matmul %32, %33, %cst_16 {dimension_numbers = #tpu.dot_dimension_numbers<[1], [0], [0], [1], [0, 0, 1, 1], [], []>} : vector<8x128xbf16>, vector<128x128xbf16>, vector<8x128xf32> -> vector<8x128xf32>
    %c0_17 = arith.constant 0 : index
    %c0_18 = arith.constant 0 : index
    %35 = vector.load %arg7[%c0_17, %c0_18] : memref<1x128xf32, #tpu.memory_space<vmem>>, vector<1x128xf32>
    %36 = vector.broadcast %35 : vector<1x128xf32> to vector<8x128xf32>
    %37 = arith.addf %34, %36 : vector<8x128xf32>
    %38 = arith.truncf %37 : vector<8x128xf32> to vector<8x128xbf16>
    %39 = arith.negf %38 : vector<8x128xbf16>
    %40 = math.exp %39 : vector<8x128xbf16>
    %cst_19 = arith.constant 1.000000e+00 : bf16
    %41 = vector.broadcast %cst_19 : bf16 to vector<8x128xbf16>
    %42 = arith.addf %41, %40 : vector<8x128xbf16>
    %43 = arith.divf %41, %42 : vector<8x128xbf16>
    %44 = arith.extf %43 : vector<8x128xbf16> to vector<8x128xf32>
    %45 = arith.mulf %37, %44 : vector<8x128xf32>
    %46 = arith.addf %45, %31 : vector<8x128xf32>
    %47 = arith.truncf %46 : vector<8x128xf32> to vector<8x128xbf16>
    %c0_20 = arith.constant 0 : index
    %c0_21 = arith.constant 0 : index
    %48 = vector.load %arg8[%c0_20, %c0_21] : memref<128x128xbf16, #tpu.memory_space<vmem>>, vector<128x128xbf16>
    %cst_22 = arith.constant dense<0.000000e+00> : vector<8x128xf32>
    %49 = tpu.matmul %47, %48, %cst_22 {dimension_numbers = #tpu.dot_dimension_numbers<[1], [0], [0], [1], [0, 0, 1, 1], [], []>} : vector<8x128xbf16>, vector<128x128xbf16>, vector<8x128xf32> -> vector<8x128xf32>
    %c0_23 = arith.constant 0 : index
    %c0_24 = arith.constant 0 : index
    %50 = vector.load %arg9[%c0_23, %c0_24] : memref<1x128xf32, #tpu.memory_space<vmem>>, vector<1x128xf32>
    %51 = vector.broadcast %50 : vector<1x128xf32> to vector<8x128xf32>
    %52 = arith.addf %49, %51 : vector<8x128xf32>
    %53 = arith.truncf %52 : vector<8x128xf32> to vector<8x128xbf16>
    %54 = arith.negf %53 : vector<8x128xbf16>
    %55 = math.exp %54 : vector<8x128xbf16>
    %cst_25 = arith.constant 1.000000e+00 : bf16
    %56 = vector.broadcast %cst_25 : bf16 to vector<8x128xbf16>
    %57 = arith.addf %56, %55 : vector<8x128xbf16>
    %58 = arith.divf %56, %57 : vector<8x128xbf16>
    %59 = arith.extf %58 : vector<8x128xbf16> to vector<8x128xf32>
    %60 = arith.mulf %52, %59 : vector<8x128xf32>
    %61 = arith.addf %60, %46 : vector<8x128xf32>
    %62 = arith.truncf %61 : vector<8x128xf32> to vector<8x128xbf16>
    %c0_26 = arith.constant 0 : index
    %c0_27 = arith.constant 0 : index
    %63 = vector.load %arg10[%c0_26, %c0_27] : memref<128x128xbf16, #tpu.memory_space<vmem>>, vector<128x128xbf16>
    %cst_28 = arith.constant dense<0.000000e+00> : vector<8x128xf32>
    %64 = tpu.matmul %62, %63, %cst_28 {dimension_numbers = #tpu.dot_dimension_numbers<[1], [0], [0], [1], [0, 0, 1, 1], [], []>} : vector<8x128xbf16>, vector<128x128xbf16>, vector<8x128xf32> -> vector<8x128xf32>
    %c0_29 = arith.constant 0 : index
    %c0_30 = arith.constant 0 : index
    %65 = vector.load %arg11[%c0_29, %c0_30] : memref<1x128xf32, #tpu.memory_space<vmem>>, vector<1x128xf32>
    %66 = vector.broadcast %65 : vector<1x128xf32> to vector<8x128xf32>
    %67 = arith.addf %64, %66 : vector<8x128xf32>
    %68 = arith.truncf %67 : vector<8x128xf32> to vector<8x128xbf16>
    %69 = arith.negf %68 : vector<8x128xbf16>
    %70 = math.exp %69 : vector<8x128xbf16>
    %cst_31 = arith.constant 1.000000e+00 : bf16
    %71 = vector.broadcast %cst_31 : bf16 to vector<8x128xbf16>
    %72 = arith.addf %71, %70 : vector<8x128xbf16>
    %73 = arith.divf %71, %72 : vector<8x128xbf16>
    %74 = arith.extf %73 : vector<8x128xbf16> to vector<8x128xf32>
    %75 = arith.mulf %67, %74 : vector<8x128xf32>
    %76 = arith.addf %75, %61 : vector<8x128xf32>
    %77 = arith.truncf %76 : vector<8x128xf32> to vector<8x128xbf16>
    %c0_32 = arith.constant 0 : index
    %c0_33 = arith.constant 0 : index
    %78 = vector.load %arg12[%c0_32, %c0_33] : memref<128x128xbf16, #tpu.memory_space<vmem>>, vector<128x128xbf16>
    %cst_34 = arith.constant dense<0.000000e+00> : vector<8x128xf32>
    %79 = tpu.matmul %77, %78, %cst_34 {dimension_numbers = #tpu.dot_dimension_numbers<[1], [0], [0], [1], [0, 0, 1, 1], [], []>} : vector<8x128xbf16>, vector<128x128xbf16>, vector<8x128xf32> -> vector<8x128xf32>
    %c0_35 = arith.constant 0 : index
    %c0_36 = arith.constant 0 : index
    %80 = vector.load %arg13[%c0_35, %c0_36] : memref<1x128xf32, #tpu.memory_space<vmem>>, vector<1x128xf32>
    %81 = vector.broadcast %80 : vector<1x128xf32> to vector<8x128xf32>
    %82 = arith.addf %79, %81 : vector<8x128xf32>
    %83 = arith.truncf %82 : vector<8x128xf32> to vector<8x128xbf16>
    %84 = arith.negf %83 : vector<8x128xbf16>
    %85 = math.exp %84 : vector<8x128xbf16>
    %cst_37 = arith.constant 1.000000e+00 : bf16
    %86 = vector.broadcast %cst_37 : bf16 to vector<8x128xbf16>
    %87 = arith.addf %86, %85 : vector<8x128xbf16>
    %88 = arith.divf %86, %87 : vector<8x128xbf16>
    %89 = arith.extf %88 : vector<8x128xbf16> to vector<8x128xf32>
    %90 = arith.mulf %82, %89 : vector<8x128xf32>
    %91 = arith.addf %90, %76 : vector<8x128xf32>
    %92 = arith.truncf %91 : vector<8x128xf32> to vector<8x128xbf16>
    %c0_38 = arith.constant 0 : index
    %c0_39 = arith.constant 0 : index
    %93 = vector.load %arg14[%c0_38, %c0_39] : memref<128x8xbf16, #tpu.memory_space<vmem>>, vector<128x8xbf16>
    %cst_40 = arith.constant dense<0.000000e+00> : vector<8x8xf32>
    %94 = tpu.matmul %92, %93, %cst_40 {dimension_numbers = #tpu.dot_dimension_numbers<[1], [0], [0], [1], [0, 0, 1, 1], [], []>} : vector<8x128xbf16>, vector<128x8xbf16>, vector<8x8xf32> -> vector<8x8xf32>
    %c0_41 = arith.constant 0 : index
    %c0_42 = arith.constant 0 : index
    %95 = vector.load %arg15[%c0_41, %c0_42] : memref<1x8xf32, #tpu.memory_space<vmem>>, vector<1x8xf32>
    %96 = vector.broadcast %95 : vector<1x8xf32> to vector<8x8xf32>
    %97 = arith.addf %94, %96 : vector<8x8xf32>
    %c0_43 = arith.constant 0 : index
    %c0_44 = arith.constant 0 : index
    %98 = vector.load %arg16[%c0_43, %c0_44] : memref<8x8xf32, #tpu.memory_space<vmem>>, vector<8x8xf32>
    tpu.vector_store %arg16[%c0_43, %c0_44], %97 {strides = array<i32>} : memref<8x8xf32, #tpu.memory_space<vmem>>, vector<8x8xf32>,
    return
  }
  func.func @transform_0(%arg0: i32) -> (i32, i32) {
    %c0_i32 = arith.constant 0 : i32
    %c0_i32_0 = arith.constant 0 : i32
    return %arg0, %c0_i32 : i32, i32
  }
  func.func @transform_1(%arg0: i32) -> (i32, i32) {
    %c0_i32 = arith.constant 0 : i32
    %c0_i32_0 = arith.constant 0 : i32
    return %arg0, %c0_i32 : i32, i32
  }
  func.func @transform_2(%arg0: i32) -> (i32, i32) {
    %c0_i32 = arith.constant 0 : i32
    %c0_i32_0 = arith.constant 0 : i32
    %c0_i32_1 = arith.constant 0 : i32
    return %c0_i32, %c0_i32_0 : i32, i32
  }
  func.func @transform_3(%arg0: i32) -> (i32, i32) {
    %c0_i32 = arith.constant 0 : i32
    %c0_i32_0 = arith.constant 0 : i32
    %c0_i32_1 = arith.constant 0 : i32
    return %c0_i32, %c0_i32_0 : i32, i32
  }
  func.func @transform_4(%arg0: i32) -> (i32, i32) {
    %c0_i32 = arith.constant 0 : i32
    %c0_i32_0 = arith.constant 0 : i32
    %c0_i32_1 = arith.constant 0 : i32
    return %c0_i32, %c0_i32_0 : i32, i32
  }
  func.func @transform_5(%arg0: i32) -> (i32, i32) {
    %c0_i32 = arith.constant 0 : i32
    %c0_i32_0 = arith.constant 0 : i32
    %c0_i32_1 = arith.constant 0 : i32
    return %c0_i32, %c0_i32_0 : i32, i32
  }
  func.func @transform_6(%arg0: i32) -> (i32, i32) {
    %c0_i32 = arith.constant 0 : i32
    %c0_i32_0 = arith.constant 0 : i32
    %c0_i32_1 = arith.constant 0 : i32
    return %c0_i32, %c0_i32_0 : i32, i32
  }
  func.func @transform_7(%arg0: i32) -> (i32, i32) {
    %c0_i32 = arith.constant 0 : i32
    %c0_i32_0 = arith.constant 0 : i32
    %c0_i32_1 = arith.constant 0 : i32
    return %c0_i32, %c0_i32_0 : i32, i32
  }
  func.func @transform_8(%arg0: i32) -> (i32, i32) {
    %c0_i32 = arith.constant 0 : i32
    %c0_i32_0 = arith.constant 0 : i32
    %c0_i32_1 = arith.constant 0 : i32
    return %c0_i32, %c0_i32_0 : i32, i32
  }
  func.func @transform_9(%arg0: i32) -> (i32, i32) {
    %c0_i32 = arith.constant 0 : i32
    %c0_i32_0 = arith.constant 0 : i32
    %c0_i32_1 = arith.constant 0 : i32
    return %c0_i32, %c0_i32_0 : i32, i32
  }
  func.func @transform_10(%arg0: i32) -> (i32, i32) {
    %c0_i32 = arith.constant 0 : i32
    %c0_i32_0 = arith.constant 0 : i32
    %c0_i32_1 = arith.constant 0 : i32
    return %c0_i32, %c0_i32_0 : i32, i32
  }
  func.func @transform_11(%arg0: i32) -> (i32, i32) {
    %c0_i32 = arith.constant 0 : i32
    %c0_i32_0 = arith.constant 0 : i32
    %c0_i32_1 = arith.constant 0 : i32
    return %c0_i32, %c0_i32_0 : i32, i32
  }
  func.func @transform_12(%arg0: i32) -> (i32, i32) {
    %c0_i32 = arith.constant 0 : i32
    %c0_i32_0 = arith.constant 0 : i32
    %c0_i32_1 = arith.constant 0 : i32
    return %c0_i32, %c0_i32_0 : i32, i32
  }
  func.func @transform_13(%arg0: i32) -> (i32, i32) {
    %c0_i32 = arith.constant 0 : i32
    %c0_i32_0 = arith.constant 0 : i32
    %c0_i32_1 = arith.constant 0 : i32
    return %c0_i32, %c0_i32_0 : i32, i32
  }
  func.func @transform_14(%arg0: i32) -> (i32, i32) {
    %c0_i32 = arith.constant 0 : i32
    %c0_i32_0 = arith.constant 0 : i32
    %c0_i32_1 = arith.constant 0 : i32
    return %c0_i32, %c0_i32_0 : i32, i32
  }
  func.func @transform_15(%arg0: i32) -> (i32, i32) {
    %c0_i32 = arith.constant 0 : i32
    %c0_i32_0 = arith.constant 0 : i32
    return %arg0, %c0_i32 : i32, i32
  }
}

</mosaic_0001>

<bundles_post_ra>
// kernel: anet2_forward.1
= control target key start
LH: loop header
LB: loop body
LE: loop exit
PB: predicated region body
PF: predicated region fallthrough
CT: control target
= control target key end

     0   :  { %20 = vsyncpa [#allocation3], 0  ;;  %v1253_v54 = vmov 0.0   ;;  %s1255_s26 = smov 16   ;;  %vm206_vm0 = vcmask 1041408   ;;  %vm1256_vm1 = vmmov 0   ;;  %s1654_s0 = inlined_call_operand.vmem [shape: f32[2,128], index: 0, kind: input, shape index: {}]   ;;  %s1655_s1 = inlined_call_operand.vmem [shape: f32[2,4], index: 1, kind: input, shape index: {}]   ;;  %s1656_s2 = inlined_call_operand.vmem [shape: f32[256,16], index: 2, kind: input, shape index: {}]   ;;  %s1657_s3 = inlined_call_operand.vmem [shape: bf16[20,128], index: 3, kind: input, shape index: {}]   ;;  %s1658_s4 = inlined_call_operand.vmem [shape: f32[1,128], index: 4, kind: input, shape index: {}]   ;;  %s1659_s5 = inlined_call_operand.vmem [shape: bf16[128,128], index: 5, kind: input, shape index: {}]   ;;  %s1660_s6 = inlined_call_operand.vmem [shape: f32[1,128], index: 6, kind: input, shape index: {}]   ;;  %s1661_s7 = inlined_call_operand.vmem [shape: bf16[128,128], index: 7, kind: input, shape index: {}]   ;;  %s1662_s8 = inlined_call_operand.vmem [shape: f32[1,128], index: 8, kind: input, shape index: {}]   ;;  %s1663_s9 = inlined_call_operand.vmem [shape: bf16[128,128], index: 9, kind: input, shape index: {}]   ;;  %s1664_s10 = inlined_call_operand.vmem [shape: f32[1,128], index: 10, kind: input, shape index: {}]   ;;  %s1665_s11 = inlined_call_operand.vmem [shape: bf16[128,128], index: 11, kind: input, shape index: {}]   ;;  %s1666_s12 = inlined_call_operand.vmem [shape: f32[1,128], index: 12, kind: input, shape index: {}]   ;;  %s1667_s13 = inlined_call_operand.vmem [shape: bf16[128,8], index: 13, kind: input, shape index: {}]   ;;  %s1668_s14 = inlined_call_operand.vmem [shape: f32[1,8], index: 14, kind: input, shape index: {}]   ;;  %s1669_s15 = inlined_call_operand.hbm [shape: f32[2,8], index: 15, kind: output, shape index: {}]  }
   0x1   :  { %v71_v0 = vld [vmem:[%s1656_s2 + $0x80] sm:$0xff]  ;;  %v72_v1 = vld [vmem:[%s1656_s2 + $0x88] sm:$0xff]  ;;  %v73_v5 = vld [vmem:[%s1656_s2 + $0x90] sm:$0xff]  ;;  %1018 = vmatprep.subr.bf16.mxu1 %v1253_v54  ;;  %1022 = vmatprep.mubr.msk.bf16.mxu1 %vm1256_vm1, %v1253_v54  ;;  %vm178_vm3 = vcmask 64512   ;;  %vm180_vm5 = vcmask 130048   ;;  %vm202_vm6 = vcmask 162816  }
   0x2   :  { %v1126_v2 = vpack.c.bf16 %v72_v1, %v71_v0  ;;  %v55_v3 = vld [vmem:[%s1656_s2] sm:$0xff]  ;;  %v56_v4 = vld [vmem:[%s1656_s2 + $0x8] sm:$0xff]  ;;  %v74_v7 = vld [vmem:[%s1656_s2 + $0x98] sm:$0xff] }
   0x3   :  { %v1128_v6 = vpack.c.bf16 %v56_v4, %v55_v3  ;;  %v57_v8 = vld [vmem:[%s1656_s2 + $0x10] sm:$0xff]  ;;  %v58_v9 = vld [vmem:[%s1656_s2 + $0x18] sm:$0xff]  ;;  %v1130_v10 = vpack.c.bf16 %v74_v7, %v73_v5  ;;  %v75_v11 = vld [vmem:[%s1656_s2 + $0xa0] sm:$0xff] }
   0x4   :  { %1127 = vmatprep.subr.bf16.mxu0 %v1126_v2  ;;  %v76_v12 = vld [vmem:[%s1656_s2 + $0xa8] sm:$0xff]  ;;  %v1132_v13 = vpack.c.bf16 %v58_v9, %v57_v8  ;;  %v59_v15 = vld [vmem:[%s1656_s2 + $0x20] sm:$0xff]  ;;  %v77_v17 = vld [vmem:[%s1656_s2 + $0xb0] sm:$0xff] }
   0x5   :  { %1129 = vmatpush3.bf16.msra.mxu0 %v1128_v6  ;;  %v1134_v14 = vpack.c.bf16 %v76_v12, %v75_v11  ;;  %v60_v16 = vld [vmem:[%s1656_s2 + $0x28] sm:$0xff]  ;;  %v78_v18 = vld [vmem:[%s1656_s2 + $0xb8] sm:$0xff]  ;;  %v61_v21 = vld [vmem:[%s1656_s2 + $0x30] sm:$0xff] }
   0x6   :  { %1131 = vmatprep.subr.bf16.mxu0 %v1130_v10  ;;  %v1136_v19 = vpack.c.bf16 %v60_v16, %v59_v15  ;;  %v1138_v20 = vpack.c.bf16 %v78_v18, %v77_v17  ;;  %v62_v22 = vld [vmem:[%s1656_s2 + $0x38] sm:$0xff]  ;;  %v79_v23 = vld [vmem:[%s1656_s2 + $0xc0] sm:$0xff]  ;;  %v80_v24 = vld [vmem:[%s1656_s2 + $0xc8] sm:$0xff] }
   0x7   :  { %v63_v25 = vld [vmem:[%s1656_s2 + $0x40] sm:$0xff]  ;;  %v64_v26 = vld [vmem:[%s1656_s2 + $0x48] sm:$0xff]  ;;  %v1140_v28 = vpack.c.bf16 %v62_v22, %v61_v21  ;;  %v81_v29 = vld [vmem:[%s1656_s2 + $0xd0] sm:$0xff]  ;;  %v1142_v32 = vpack.c.bf16 %v80_v24, %v79_v23 }
   0x8   :  { %v53_v27 = vld [vmem:[%s1654_s0] sm:$0xff]  ;;  %v82_v30 = vld [vmem:[%s1656_s2 + $0xd8] sm:$0xff]  ;;  %v65_v33 = vld [vmem:[%s1656_s2 + $0x50] sm:$0xff]  ;;  %v1144_v35 = vpack.c.bf16 %v64_v26, %v63_v25 }
   0x9   :  { %1133 = vmatpush3.bf16.msra.mxu0 %v1132_v13  ;;  %v87_v31 = vmul.f32 %v53_v27, %v53_v27  ;;  %v66_v34 = vld [vmem:[%s1656_s2 + $0x58] sm:$0xff]  ;;  %v83_v36 = vld [vmem:[%s1656_s2 + $0xe0] sm:$0xff]  ;;  %v84_v37 = vld [vmem:[%s1656_s2 + $0xe8] sm:$0xff]  ;;  %v1146_v38 = vpack.c.bf16 %v82_v30, %v81_v29 }
   0xa   :  { %1135 = vmatprep.subr.bf16.mxu0 %v1134_v14  ;;  %v67_v39 = vld [vmem:[%s1656_s2 + $0x60] sm:$0xff]  ;;  %v68_v40 = vld [vmem:[%s1656_s2 + $0x68] sm:$0xff]  ;;  %v1148_v41 = vpack.c.bf16 %v66_v34, %v65_v33  ;;  %v85_v42 = vld [vmem:[%s1656_s2 + $0xf0] sm:$0xff]  ;;  %v1150_v44 = vpack.c.bf16 %v84_v37, %v83_v36 }
   0xb   :  { %152 = vmatprep.mubr.f32.mxu0 %v87_v31  ;;  %v86_v43 = vld [vmem:[%s1656_s2 + $0xf8] sm:$0xff]  ;;  %v69_v45 = vld [vmem:[%s1656_s2 + $0x70] sm:$0xff]  ;;  %v1152_v47 = vpack.c.bf16 %v68_v40, %v67_v39  ;;  %v1165_v52 = vld [vmem:[%s1657_s3] sm:$0xff]  }
   0xc   :  { %v70_v46 = vld [vmem:[%s1656_s2 + $0x78] sm:$0xff]  ;;  %v1154_v48 = vpack.c.bf16 %v86_v43, %v85_v42  ;;  %1019 = vmatpush3.bf16.msra.mxu1 %v1165_v52  ;;  %s1254_s2 = smov 8   ;;  %v54_v57 = vld [vmem:[%s1655_s1] sm:$0xff]  ;;  %v1166_v58 = vld [vmem:[%s1657_s3 + $0x8] ss:$0 sps:$4 sm:$0x33]  }
   0xd   :  { %1137 = vmatpush3.bf16.msra.mxu0 %v1136_v19  ;;  %v1156_v49 = vpack.c.bf16 %v70_v46, %v69_v45  ;;  %1020 = vmatprep.subr.bf16.mxu1 %v1253_v54  ;;  %v208_v59 = vsel %vm206_vm0, %v1166_v58, 0  ;;  %v1167_v9 = vld [vmem:[%s1659_s5] sm:$0xff]   ;;  %v1168_v10 = vld [vmem:[%s1659_s5 + $0x8] sm:$0xff]   ;;  %v1169_v11 = vld [vmem:[%s1659_s5 + $0x10] sm:$0xff]  }
   0xe   :  { %1139 = vmatprep.subr.bf16.mxu0 %v1138_v20  ;;  %v1170_v12 = vld [vmem:[%s1659_s5 + $0x18] sm:$0xff]   ;;  %v1171_v13 = vld [vmem:[%s1659_s5 + $0x20] sm:$0xff]   ;;  %v1172_v14 = vld [vmem:[%s1659_s5 + $0x28] sm:$0xff]  }
   0xf   :  { %v1173_v15 = vld [vmem:[%s1659_s5 + $0x30] sm:$0xff]   ;;  %v1174_v16 = vld [vmem:[%s1659_s5 + $0x38] sm:$0xff]   ;;  %v881_v17 = vld [vmem:[%s1658_s4] ss:$0 sm:$0xff] }
  0x10   :  { %1021 = vmatpush3.bf16.msra.mxu1 %v208_v59  ;;  %v1176_v33 = vld [vmem:[%s1661_s7 + $0x8] sm:$0xff]   ;;  %v1177_v34 = vld [vmem:[%s1661_s7 + $0x10] sm:$0xff]   ;;  %v1179_v36 = vld [vmem:[%s1661_s7 + $0x20] sm:$0xff]  }
  0x11   :  { %1141 = vmatpush3.bf16.msra.mxu0 %v1140_v28  ;;  %1026 = vmatprep.subr.bf16.mxu1 %v1253_v54  ;;  %v1180_v37 = vld [vmem:[%s1661_s7 + $0x28] sm:$0xff]   ;;  %v1182_v39 = vld [vmem:[%s1661_s7 + $0x38] sm:$0xff]   ;;  %v886_v40 = vld [vmem:[%s1660_s6] ss:$0 sm:$0xff] }
  0x12   :  { %1143 = vmatprep.subr.bf16.mxu0 %v1142_v32  ;;  %v1175_v32 = vld [vmem:[%s1661_s7] sm:$0xff]   ;;  %v1184_v58 = vld [vmem:[%s1663_s9 + $0x8] sm:$0xff]   ;;  %v1185_v59 = vld [vmem:[%s1663_s9 + $0x10] sm:$0xff]  }
  0x15   :  { %1145 = vmatpush3.bf16.msra.mxu0 %v1144_v35  ;;  %v1178_v35 = vld [vmem:[%s1661_s7 + $0x18] sm:$0xff]  }
  0x16   :  { %1147 = vmatprep.subr.bf16.mxu0 %v1146_v38  ;;  %v1181_v38 = vld [vmem:[%s1661_s7 + $0x30] sm:$0xff]  }
  0x19   :  { %1149 = vmatpush3.bf16.msra.mxu0 %v1148_v41 }
  0x1a   :  { %1151 = vmatprep.subr.bf16.mxu0 %v1150_v44 }
  0x1d   :  { %1153 = vmatpush3.bf16.msra.mxu0 %v1152_v47 }
  0x1e   :  { %1155 = vmatprep.subr.bf16.mxu0 %v1154_v48 }
  0x21   :  { %1157 = vmatpush3.bf16.msra.mxu0 %v1156_v49 }
  0x22   :  { %1046 = vmatprep.subr.bf16.mxu0 %v1253_v54 }
  0x24   :  { %153 = vmatmul.mubr.f32.vlgmr.msra.gmra.mrb[0].mxu0 %v53_v27 }
  0x25   :  { %1062 = vmatprep.mubr.msk.bf16.mxu0 %vm1256_vm1, %v1253_v54  ;;  %1047 = vmatpush3.bf16.msra.mxu0 %v1175_v32 }
  0x26   :  { %1048 = vmatprep.subr.bf16.mxu0 %v1253_v54 }
  0x29   :  { %1049 = vmatpush3.bf16.msra.mxu0 %v1176_v33 }
  0x2a   :  { %1050 = vmatprep.subr.bf16.mxu0 %v1253_v54 }
  0x2d   :  { %1051 = vmatpush3.bf16.msra.mxu0 %v1177_v34 }
  0x2e   :  { %1052 = vmatprep.subr.bf16.mxu0 %v1253_v54 }
  0x31   :  { %1053 = vmatpush3.bf16.msra.mxu0 %v1178_v35 }
  0x32   :  { %1054 = vmatprep.subr.bf16.mxu0 %v1253_v54 }
  0x35   :  { %1055 = vmatpush3.bf16.msra.mxu0 %v1179_v36 }
  0x36   :  { %1056 = vmatprep.subr.bf16.mxu0 %v1253_v54 }
  0x39   :  { %1057 = vmatpush3.bf16.msra.mxu0 %v1180_v37 }
  0x3a   :  { %1058 = vmatprep.subr.bf16.mxu0 %v1253_v54 }
  0x3d   :  { %1059 = vmatpush3.bf16.msra.mxu0 %v1181_v38 }
  0x3e   :  { %1060 = vmatprep.subr.bf16.mxu0 %v1253_v54 }
  0x41   :  { %1061 = vmatpush3.bf16.msra.mxu0 %v1182_v39 }
  0x42   :  { %1086 = vmatprep.subr.bf16.mxu0 %v1253_v54 }
  0xf7   :  { %v967_v50 = vpop.f32.mrb[0].mxu0 }
  0xf8   :  { %v968_v51 = vpop.f32.mrb[1].mxu0 }
  0xf9   :  { %v969_v53 = vadd.f32 %v968_v51, %v967_v50 }
  0xfb   :  { %v158_v55 = vmul.f32 %v969_v53, %v969_v53 }
  0xfd   :  { %v159_v56 = vmul.f32 16.0, %v158_v55 }
  0xff   :  { %161 = vrot.lane.b32.xlu0 %v159_v56, %s1254_s2 }
 0x103   :  { %175 = vrot.lane.b32.xlu0 %v54_v57, %s1255_s26  ;;  %v1183_v57 = vld [vmem:[%s1663_s9] sm:$0xff]  }
 0x171   :  { %v162_v60 = vpop.permute.xlu0 %161 }
 0x172   :  { %v164_v61 = vsub.f32 %v969_v53, %v162_v60  ;;  %v1186_v60 = vld [vmem:[%s1663_s9 + $0x18] sm:$0xff]  }
 0x174   :  { %v165_v62 = vmax.f32 %v164_v61, 0.0  ;;  %v1187_v61 = vld [vmem:[%s1663_s9 + $0x20] sm:$0xff]  }
 0x175   :  { %v176_v4 = vpop.permute.xlu0 %175 }
 0x176   :  { %v166_v63 = vmul.f32 0.06666667, %v165_v62  ;;  %v1188_v62 = vld [vmem:[%s1663_s9 + $0x28] sm:$0xff]  }
 0x178   :  { %1207 = vrsqrt.f32 %v166_v63  ;;  %vm169_vm2 = vcmp.eq.f32.partialorder %v166_v63, inf  ;;  %v172_v2 = vand.u32 2147483648, %v166_v63  ;;  %vm171_vm4 = vcmp.eq.f32.partialorder %v166_v63, 0.0 }
 0x182   :  { %v1208_v0 = vpop.eup %1207 }
 0x183   :  { %v168_v1 = vmul.f32 %v1208_v0, %v166_v63  ;;  %v1190_v0 = vld [vmem:[%s1663_s9 + $0x38] sm:$0xff]  }
 0x185   :  { %v170_v3 = vsel %vm169_vm2, %v166_v63, %v168_v1  ;;  %v1189_v63 = vld [vmem:[%s1663_s9 + $0x30] sm:$0xff]   ;;  %v896_v1 = vld [vmem:[%s1662_s8] ss:$0 sm:$0xff] }
 0x186   :  { %v173_v5 = vsel %vm171_vm4, %v172_v2, %v170_v3 }
 0x187   :  { %v179_v6 = vsel %vm178_vm3, %v969_v53, %v173_v5 }
 0x188   :  { %v181_v7 = vsel %vm180_vm5, %v179_v6, %v176_v4 }
 0x189   :  { %v182_v8 = vpack.c.bf16 %v181_v7, %v181_v7 }
 0x18b   :  { %1023 = vmatmul.mubr.msk.bf16.vlgmr.msra.gmra.mrb[0].mxu1 %vm202_vm6, %v182_v8 }
 0x18c   :  { %1042 = vmatprep.mubr.msk.bf16.mxu1 %vm1256_vm1, %v1253_v54  ;;  %1027 = vmatpush3.bf16.msra.mxu1 %v1167_v9 }
 0x18d   :  { %1028 = vmatprep.subr.bf16.mxu1 %v1253_v54 }
 0x190   :  { %1029 = vmatpush3.bf16.msra.mxu1 %v1168_v10 }
 0x191   :  { %1030 = vmatprep.subr.bf16.mxu1 %v1253_v54 }
 0x194   :  { %1031 = vmatpush3.bf16.msra.mxu1 %v1169_v11 }
 0x195   :  { %1032 = vmatprep.subr.bf16.mxu1 %v1253_v54 }
 0x198   :  { %1033 = vmatpush3.bf16.msra.mxu1 %v1170_v12 }
 0x199   :  { %1034 = vmatprep.subr.bf16.mxu1 %v1253_v54 }
 0x19c   :  { %1035 = vmatpush3.bf16.msra.mxu1 %v1171_v13 }
 0x19d   :  { %1036 = vmatprep.subr.bf16.mxu1 %v1253_v54 }
 0x1a0   :  { %1037 = vmatpush3.bf16.msra.mxu1 %v1172_v14 }
 0x1a1   :  { %1038 = vmatprep.subr.bf16.mxu1 %v1253_v54 }
 0x1a4   :  { %1039 = vmatpush3.bf16.msra.mxu1 %v1173_v15 }
 0x1a5   :  { %1040 = vmatprep.subr.bf16.mxu1 %v1253_v54 }
 0x1a8   :  { %1041 = vmatpush3.bf16.msra.mxu1 %v1174_v16 }
 0x1a9   :  { %1066 = vmatprep.subr.bf16.mxu1 %v1253_v54 }
 0x25e   :  { %v244_v18 = vpop.f32.mrb[0].mxu1 }
 0x25f   :  { %v245_v19 = vadd.f32 %v881_v17, %v244_v18  ;;  %v1024_v20 = vpop.f32.mrb[1].mxu1  ;;  %v1191_v17 = vld [vmem:[%s1665_s11] sm:$0xff]   ;;  %v1192_v18 = vld [vmem:[%s1665_s11 + $0x8] sm:$0xff]  }
 0x260   :  { %v247_v21 = vpop.f32.mrb[2].mxu1  ;;  %v1194_v20 = vld [vmem:[%s1665_s11 + $0x18] sm:$0xff]  }
 0x261   :  { %v250_v22 = vpack.c.bf16 %v245_v19, %v245_v19  ;;  %v1025_v23 = vpop.f32.mrb[3].mxu1  ;;  %v1195_v21 = vld [vmem:[%s1665_s11 + $0x20] sm:$0xff]  }
 0x262   :  { %v1197_v23 = vld [vmem:[%s1665_s11 + $0x30] sm:$0xff]  }
 0x263   :  { %v885_v24 = vmul.bf16 3216621497, %v250_v22  ;;  %v1196_v22 = vld [vmem:[%s1665_s11 + $0x28] sm:$0xff]  }
 0x265   :  { %1209 = vpow.bf16 %v885_v24  ;;  %v1198_v24 = vld [vmem:[%s1665_s11 + $0x38] sm:$0xff]  }
 0x270   :  { %v1210_v25 = vpop.eup %1209 }
 0x271   :  { %v255_v26 = vadd.bf16 1065369472, %v1210_v25  ;;  %v906_v25 = vld [vmem:[%s1664_s10] ss:$0 sm:$0xff] }
 0x273   :  { %1211 = vrcp.bf16 %v255_v26 }
 0x27e   :  { %v1212_v27 = vpop.eup %1211 }
 0x27f   :  { %v257_v28 = vmul.bf16 1065369472, %v1212_v27 }
 0x281   :  { %v258_v29 = vunpack.c.l.bf16 %v257_v28 }
 0x283   :  { %v259_v30 = vmul.f32 %v258_v29, %v245_v19  ;;  %v1193_v19 = vld [vmem:[%s1665_s11 + $0x10] sm:$0xff]  }
 0x285   :  { %v260_v31 = vpack.c.bf16 %v259_v30, %v259_v30 }
 0x287   :  { %1043 = vmatmul.mubr.bf16.vlgmr.msra.gmra.mrb[4].mxu1 %v260_v31 }
 0x288   :  { %1082 = vmatprep.mubr.msk.bf16.mxu1 %vm1256_vm1, %v1253_v54  ;;  %1067 = vmatpush3.bf16.msra.mxu1 %v1183_v57 }
 0x289   :  { %1068 = vmatprep.subr.bf16.mxu1 %v1253_v54 }
 0x28c   :  { %1069 = vmatpush3.bf16.msra.mxu1 %v1184_v58 }
 0x28d   :  { %1070 = vmatprep.subr.bf16.mxu1 %v1253_v54 }
 0x290   :  { %1071 = vmatpush3.bf16.msra.mxu1 %v1185_v59 }
 0x291   :  { %1072 = vmatprep.subr.bf16.mxu1 %v1253_v54 }
 0x294   :  { %1073 = vmatpush3.bf16.msra.mxu1 %v1186_v60 }
 0x295   :  { %1074 = vmatprep.subr.bf16.mxu1 %v1253_v54 }
 0x298   :  { %1075 = vmatpush3.bf16.msra.mxu1 %v1187_v61 }
 0x299   :  { %1076 = vmatprep.subr.bf16.mxu1 %v1253_v54 }
 0x29c   :  { %1077 = vmatpush3.bf16.msra.mxu1 %v1188_v62 }
 0x29d   :  { %1078 = vmatprep.subr.bf16.mxu1 %v1253_v54 }
 0x2a0   :  { %1079 = vmatpush3.bf16.msra.mxu1 %v1189_v63 }
 0x2a1   :  { %1080 = vmatprep.subr.bf16.mxu1 %v1253_v54 }
 0x2a4   :  { %1081 = vmatpush3.bf16.msra.mxu1 %v1190_v0 }
 0x2a5   :  { %1106 = vmatprep.subr.bf16.mxu1 %v1253_v54 }
 0x35a   :  { %v366_v41 = vpop.f32.mrb[4].mxu1 }
 0x35b   :  { %v367_v42 = vadd.f32 %v886_v40, %v366_v41  ;;  %v1044_v43 = vpop.f32.mrb[5].mxu1  ;;  %v1199_v41 = vld [vmem:[%s1667_s13] sm:$0xff]  }
 0x35c   :  { %v369_v44 = vpop.f32.mrb[6].mxu1  ;;  %v1201_v43 = vld [vmem:[%s1667_s13 + $0x10] sm:$0xff]  }
 0x35d   :  { %v372_v45 = vpack.c.bf16 %v367_v42, %v367_v42  ;;  %v1045_v46 = vpop.f32.mrb[7].mxu1  ;;  %v1202_v44 = vld [vmem:[%s1667_s13 + $0x18] sm:$0xff]  }
 0x35e   :  { %v1204_v46 = vld [vmem:[%s1667_s13 + $0x28] sm:$0xff]  }
 0x35f   :  { %v895_v47 = vmul.bf16 3216621497, %v372_v45  ;;  %v1203_v45 = vld [vmem:[%s1667_s13 + $0x20] sm:$0xff]  }
 0x361   :  { %1213 = vpow.bf16 %v895_v47  ;;  %v1205_v47 = vld [vmem:[%s1667_s13 + $0x30] sm:$0xff]  }
 0x36c   :  { %v1214_v48 = vpop.eup %1213 }
 0x36d   :  { %v377_v49 = vadd.bf16 1065369472, %v1214_v48  ;;  %v1206_v48 = vld [vmem:[%s1667_s13 + $0x38] sm:$0xff]  }
 0x36f   :  { %1215 = vrcp.bf16 %v377_v49  ;;  %v916_v49 = vld [vmem:[%s1666_s12] ss:$0 sm:$0xff] }
 0x37a   :  { %v1216_v50 = vpop.eup %1215 }
 0x37b   :  { %v379_v51 = vmul.bf16 1065369472, %v1216_v50 }
 0x37d   :  { %v380_v52 = vunpack.c.l.bf16 %v379_v51 }
 0x37f   :  { %v381_v53 = vmul.f32 %v380_v52, %v367_v42  ;;  %v1200_v42 = vld [vmem:[%s1667_s13 + $0x8] sm:$0xff]  }
 0x381   :  { %v382_v55 = vadd.f32 %v381_v53, %v259_v30 }
 0x383   :  { %v383_v56 = vpack.c.bf16 %v382_v55, %v382_v55 }
 0x385   :  { %1063 = vmatmul.mubr.bf16.vlgmr.msra.gmra.mrb[4].mxu0 %v383_v56 }
 0x386   :  { %1102 = vmatprep.mubr.msk.bf16.mxu0 %vm1256_vm1, %v1253_v54  ;;  %1087 = vmatpush3.bf16.msra.mxu0 %v1191_v17 }
 0x387   :  { %1088 = vmatprep.subr.bf16.mxu0 %v1253_v54 }
 0x38a   :  { %1089 = vmatpush3.bf16.msra.mxu0 %v1192_v18 }
 0x38b   :  { %1090 = vmatprep.subr.bf16.mxu0 %v1253_v54 }
 0x38e   :  { %1091 = vmatpush3.bf16.msra.mxu0 %v1193_v19 }
 0x38f   :  { %1092 = vmatprep.subr.bf16.mxu0 %v1253_v54 }
 0x392   :  { %1093 = vmatpush3.bf16.msra.mxu0 %v1194_v20 }
 0x393   :  { %1094 = vmatprep.subr.bf16.mxu0 %v1253_v54 }
 0x396   :  { %1095 = vmatpush3.bf16.msra.mxu0 %v1195_v21 }
 0x397   :  { %1096 = vmatprep.subr.bf16.mxu0 %v1253_v54 }
 0x39a   :  { %1097 = vmatpush3.bf16.msra.mxu0 %v1196_v22 }
 0x39b   :  { %1098 = vmatprep.subr.bf16.mxu0 %v1253_v54 }
 0x39e   :  { %1099 = vmatpush3.bf16.msra.mxu0 %v1197_v23 }
 0x39f   :  { %1100 = vmatprep.subr.bf16.mxu0 %v1253_v54 }
 0x3a2   :  { %1101 = vmatpush3.bf16.msra.mxu0 %v1198_v24 }
 0x458   :  { %v489_v2 = vpop.f32.mrb[4].mxu0 }
 0x459   :  { %v490_v3 = vadd.f32 %v896_v1, %v489_v2  ;;  %v1064_v4 = vpop.f32.mrb[5].mxu0  ;;  %v926_v1 = vld [vmem:[%s1668_s14] ss:$0 sm:$0xff] }
 0x45a   :  { %v492_v5 = vpop.f32.mrb[6].mxu0 }
 0x45b   :  { %v495_v6 = vpack.c.bf16 %v490_v3, %v490_v3  ;;  %v1065_v7 = vpop.f32.mrb[7].mxu0 }
 0x45d   :  { %v905_v8 = vmul.bf16 3216621497, %v495_v6 }
 0x45f   :  { %1217 = vpow.bf16 %v905_v8 }
 0x46a   :  { %v1218_v9 = vpop.eup %1217 }
 0x46b   :  { %v500_v10 = vadd.bf16 1065369472, %v1218_v9 }
 0x46d   :  { %1219 = vrcp.bf16 %v500_v10 }
 0x478   :  { %v1220_v11 = vpop.eup %1219 }
 0x479   :  { %v502_v12 = vmul.bf16 1065369472, %v1220_v11 }
 0x47b   :  { %v503_v13 = vunpack.c.l.bf16 %v502_v12 }
 0x47d   :  { %v504_v14 = vmul.f32 %v503_v13, %v490_v3 }
 0x47f   :  { %v505_v15 = vadd.f32 %v504_v14, %v382_v55 }
 0x481   :  { %v506_v16 = vpack.c.bf16 %v505_v15, %v505_v15 }
 0x483   :  { %1083 = vmatmul.mubr.bf16.vlgmr.msra.gmra.mrb[8].mxu1 %v506_v16 }
 0x484   :  { %1122 = vmatprep.mubr.msk.bf16.mxu1 %vm1256_vm1, %v1253_v54  ;;  %1107 = vmatpush3.bf16.msra.mxu1 %v1199_v41 }
 0x485   :  { %1108 = vmatprep.subr.bf16.mxu1 %v1253_v54 }
 0x488   :  { %1109 = vmatpush3.bf16.msra.mxu1 %v1200_v42 }
 0x489   :  { %1110 = vmatprep.subr.bf16.mxu1 %v1253_v54 }
 0x48c   :  { %1111 = vmatpush3.bf16.msra.mxu1 %v1201_v43 }
 0x48d   :  { %1112 = vmatprep.subr.bf16.mxu1 %v1253_v54 }
 0x490   :  { %1113 = vmatpush3.bf16.msra.mxu1 %v1202_v44 }
 0x491   :  { %1114 = vmatprep.subr.bf16.mxu1 %v1253_v54 }
 0x494   :  { %1115 = vmatpush3.bf16.msra.mxu1 %v1203_v45 }
 0x495   :  { %1116 = vmatprep.subr.bf16.mxu1 %v1253_v54 }
 0x498   :  { %1117 = vmatpush3.bf16.msra.mxu1 %v1204_v46 }
 0x499   :  { %1118 = vmatprep.subr.bf16.mxu1 %v1253_v54 }
 0x49c   :  { %1119 = vmatpush3.bf16.msra.mxu1 %v1205_v47 }
 0x49d   :  { %1120 = vmatprep.subr.bf16.mxu1 %v1253_v54 }
 0x4a0   :  { %1121 = vmatpush3.bf16.msra.mxu1 %v1206_v48 }
 0x556   :  { %v612_v26 = vpop.f32.mrb[8].mxu1 }
 0x557   :  { %v613_v27 = vadd.f32 %v906_v25, %v612_v26  ;;  %v1084_v28 = vpop.f32.mrb[9].mxu1 }
 0x558   :  { %v615_v29 = vpop.f32.mrb[10].mxu1 }
 0x559   :  { %v618_v30 = vpack.c.bf16 %v613_v27, %v613_v27  ;;  %v1085_v31 = vpop.f32.mrb[11].mxu1 }
 0x55b   :  { %v915_v32 = vmul.bf16 3216621497, %v618_v30 }
 0x55d   :  { %1221 = vpow.bf16 %v915_v32 }
 0x568   :  { %v1222_v33 = vpop.eup %1221 }
 0x569   :  { %v623_v34 = vadd.bf16 1065369472, %v1222_v33 }
 0x56b   :  { %1223 = vrcp.bf16 %v623_v34 }
 0x576   :  { %v1224_v35 = vpop.eup %1223 }
 0x577   :  { %v625_v36 = vmul.bf16 1065369472, %v1224_v35 }
 0x579   :  { %v626_v37 = vunpack.c.l.bf16 %v625_v36 }
 0x57b   :  { %v627_v38 = vmul.f32 %v626_v37, %v613_v27 }
 0x57d   :  { %v628_v39 = vadd.f32 %v627_v38, %v505_v15 }
 0x57f   :  { %v629_v40 = vpack.c.bf16 %v628_v39, %v628_v39 }
 0x581   :  { %1103 = vmatmul.mubr.bf16.vlgmr.msra.gmra.mrb[8].mxu0 %v629_v40 }
 0x654   :  { %v735_v50 = vpop.f32.mrb[8].mxu0 }
 0x655   :  { %v736_v51 = vadd.f32 %v916_v49, %v735_v50  ;;  %v1104_v52 = vpop.f32.mrb[9].mxu0 }
 0x656   :  { %v738_v53 = vpop.f32.mrb[10].mxu0 }
 0x657   :  { %v741_v55 = vpack.c.bf16 %v736_v51, %v736_v51  ;;  %v1105_v56 = vpop.f32.mrb[11].mxu0 }
 0x659   :  { %v925_v57 = vmul.bf16 3216621497, %v741_v55 }
 0x65b   :  { %1225 = vpow.bf16 %v925_v57 }
 0x666   :  { %v1226_v58 = vpop.eup %1225 }
 0x667   :  { %v746_v59 = vadd.bf16 1065369472, %v1226_v58 }
 0x669   :  { %1227 = vrcp.bf16 %v746_v59 }
 0x674   :  { %v1228_v54 = vpop.eup %1227 }
 0x675   :  { %v748_v60 = vmul.bf16 1065369472, %v1228_v54 }
 0x677   :  { %v749_v61 = vunpack.c.l.bf16 %v748_v60 }
 0x679   :  { %v750_v62 = vmul.f32 %v749_v61, %v736_v51 }
 0x67b   :  { %v751_v63 = vadd.f32 %v750_v62, %v628_v39 }
 0x67d   :  { %v752_v0 = vpack.c.bf16 %v751_v63, %v751_v63 }
 0x67f   :  { %1123 = vmatmul.mubr.bf16.vlgmr.msra.gmra.mrb[12].mxu1 %v752_v0 }
 0x752   :  { %v858_v2 = vpop.f32.mrb[12].mxu1 }
 0x753   :  { %v859_v3 = vadd.f32 %v926_v1, %v858_v2  ;;  %v1124_v4 = vpop.f32.mrb[13].mxu1 }
 0x754   :  { %v861_v5 = vpop.f32.mrb[14].mxu1 }
 0x755   :  { %864 = vst.msk [vmem:[#allocation2] sm:$0xff] %vm178_vm3, %v859_v3  ;;  %v1125_v6 = vpop.f32.mrb[15].mxu1 }
 0x756   :  { %869 = vsyncadd [#allocation3], 96  ;;  %s1257_s25 = smov [#allocation2]  }
 0x757   :  { %s870_s26 = sshll.u32 %s1257_s25, 4  ;;  %s871_s26 = int_to_ptr.vmem [resolvable:$true] %s870_s26 }
 0x758   :  { %s1229_s27 = scalar_lea.vmem %s871_s26, 32  ;;  %s1233_s4 = scalar_lea.vmem %s871_s26, 128 }
 0x759   :  { %p1230_p0 = scmp.ne.s32.totalorder %s871_s26, %s1229_s27  ;;  %p1234_p1 = scmp.lt.s32.totalorder %s871_s26, %s871_s26 }
 0x75a   :  { %p1235_p2 = scmp.lt.s32.totalorder %s1233_s4, %s1229_s27 }
 0x75c   :  { %p1236_p3 = por %p1235_p2, %p1234_p1 }
 0x75e   :  { %p1237_p4 = pnand %p1236_p3, %p1230_p0 }
 0x760   :  { %1240 = shalt.err (!%p1237_p4)
}
 0x761   :  { %s1241_s28 = scalar_lea.hbm %s1669_s15, 32 }
 0x762   :  { %p1242_p5 = scmp.ne.s32.totalorder %s1669_s15, %s1241_s28  ;;  %p1245_p6 = scmp.lt.u32.totalorder %s1241_s28, %s1669_s15 }
 0x764   :  { %p1247_p7 = pnand %p1245_p6, %p1242_p5 }
 0x766   :  { %1250 = shalt.err (!%p1247_p7)
}
 0x767   :  { %s1258_s10 = smov 32   ;;  %s1259_s30 = smov 2  }
 0x768   :  { %876 = dma.vmem_to_hbm [thread:$0]  %s871_s26, 32, %s1669_s15, [#allocation3], %s1258_s10, %s1258_s10, %s1259_s30  }
 0x769   :  { %1251 = dma.done.wait [#allocation3], 128  }
 0x76a   :  { %1252 = vsyncadd [#allocation3], 4294967168 }
 0x76b   :  { %880 = vsyncpa [#allocation3], 1 }

</bundles_post_ra>
